<compile_context>
chip_gen: v5e
topology: v5e:2x2
jax: 0.10.0
libtpu: 0.0.40
codegen_flags: <defaults>
</compile_context>

<pallas_src>
import jax
import jax.numpy as jnp
from jax.experimental import pallas as pl
from jax.experimental.pallas import tpu as pltpu

_MIB = 2 ** 20


def _round_up(v, m):
    return ((v + m - 1) // m) * m


def _resident_kernel(x_ref, w1_ref, b1_ref, w2_ref, b2_ref, o_ref):
    """Weights fully VMEM-resident: relu(relu(x@W1+b1)@W2+b2) + x in one pass."""
    x = x_ref[...]                                              # (tm, D) f32
    h = jnp.dot(x.astype(jnp.bfloat16), w1_ref[...],
                preferred_element_type=jnp.float32)             # (tm, H) f32
    h = jnp.maximum(h + b1_ref[...], 0.0)
    # dropout(p=0.5): identity in eval mode.
    y = jnp.dot(h.astype(jnp.bfloat16), w2_ref[...],
                preferred_element_type=jnp.float32)             # (tm, D) f32
    y = jnp.maximum(y + b2_ref[...], 0.0)
    # dropout(p=0.5): identity in eval mode.
    o_ref[...] = (y + x).astype(o_ref.dtype)                    # residual add


def _streamed_kernel(x_ref, w1_ref, b1_ref, w2_ref, b2_ref, o_ref, xb_ref):
    """Hidden-dim streamed path; o_ref (resident across j) is the f32 accumulator."""
    j = pl.program_id(1)

    @pl.when(j == 0)
    def _():
        # Cast x to bf16 once per batch tile; reused across the H reduction loop.
        xb_ref[...] = x_ref[...].astype(jnp.bfloat16)

    # fc1 chunk: (tm, D) @ (D, tH), bias + ReLU.
    h = jnp.dot(xb_ref[...], w1_ref[...], preferred_element_type=jnp.float32)
    h = jnp.maximum(h + b1_ref[...], 0.0)
    # dropout(p=0.5): identity in eval mode.
    # fc2 partial: (tm, tH) @ (tH, D), accumulated into the output block.
    partial = jnp.dot(h.astype(jnp.bfloat16), w2_ref[...],
                      preferred_element_type=jnp.float32)

    @pl.when(j == 0)
    def _():
        o_ref[...] = partial.astype(o_ref.dtype)

    @pl.when(j != 0)
    def _():
        o_ref[...] = (o_ref[...].astype(jnp.float32) + partial).astype(o_ref.dtype)

    @pl.when(j == pl.num_programs(1) - 1)
    def _():
        y = jnp.maximum(o_ref[...].astype(jnp.float32) + b2_ref[...], 0.0)
        # dropout(p=0.5): identity in eval mode.
        o_ref[...] = (y + x_ref[...]).astype(o_ref.dtype)       # residual add


def residual_block_widen(x, w1, b1, w2, b2, *, tile_m=None, tile_h=None,
                         force_streamed=False):
    """x: (B, D) f32. w1: (D, 4D), b1: (4D,), w2: (4D, D), b2: (D,)."""
    B, D = x.shape
    H = w1.shape[1]
    assert w1.shape == (D, H) and w2.shape == (H, D)
    assert b1.shape == (H,) and b2.shape == (D,)

    # Lane-align feature dims via zero padding (padded weight rows/cols and bias
    # entries are zero, so padded output columns are relu(0)+0 = 0 and are
    # sliced off below). Keeps stores lane-dense and the MXU fully fed for
    # small D.
    Dp = _round_up(D, 128)
    Hp = _round_up(H, 128)
    x_p = jnp.pad(x, ((0, 0), (0, Dp - D)))
    w1_p = jnp.pad(w1, ((0, Dp - D), (0, Hp - H))).astype(jnp.bfloat16)
    w2_p = jnp.pad(w2, ((0, Hp - H), (0, Dp - D))).astype(jnp.bfloat16)
    b1_p = jnp.pad(b1, (0, Hp - H)).reshape(1, Hp).astype(jnp.float32)
    b2_p = jnp.pad(b2, (0, Dp - D)).reshape(1, Dp).astype(jnp.float32)

    # ---- per-generation VMEM budget -------------------------------------
    try:
        info = pltpu.get_tpu_info()
        vmem_cap = int(getattr(info, "vmem_capacity_bytes", 128 * _MIB))
    except Exception:
        vmem_cap = 128 * _MIB
    # Leave headroom for compiler-internal scratch: ~48 MiB budget on v7x
    # (64 MiB physical), ~112 MiB on v5e/v6e (128 MiB physical).
    vmem_budget = int(max(vmem_cap - 16 * _MIB, 32 * _MIB))
    small_vmem = vmem_cap <= 80 * _MIB   # v7x-like (2 TensorCores per chip)

    # ---- rough per-step VMEM footprints (double-buffered tiles) ----------
    def resident_fp(tm):
        return (2 * Dp * Hp * 2 + 2 * Hp * Dp * 2       # W1 + W2 (bf16, 2 bufs)
                + 4 * tm * Dp * 4                       # x + out tiles (2 bufs each)
                + 2 * (Hp + Dp) * 4                     # biases
                + tm * Hp * 4 + 2 * tm * Dp * 4)        # intermediates

    def streamed_fp(tm, th):
        return (4 * tm * Dp * 4                         # x + out tiles
                + 2 * Dp * th * 2 + 2 * th * Dp * 2     # W1/W2 chunks (bf16)
                + 2 * (th + Dp) * 4                     # bias chunks
                + tm * Dp * 2                           # bf16 x scratch
                + tm * th * 4 + tm * Dp * 4)            # intermediates

    # ---- tile selection ---------------------------------------------------
    if tile_m is not None:
        m_candidates = [tile_m]
    else:
        m_candidates = [t for t in (2048, 1024, 512, 256, 128, 64, 32, 16, 8)
                        if t <= B and B % t == 0]
        if not m_candidates:
            m_candidates = [B]

    if tile_h is not None:
        h_candidates = [tile_h]
    else:
        h_candidates = [t for t in (512, 256, 128) if Hp % t == 0] or [Hp]

    chosen_m, chosen_h, resident = None, None, False
    if not force_streamed:
        for t in m_candidates:                           # largest fitting tile_m
            if resident_fp(t) <= vmem_budget:
                chosen_m, resident = t, True
                break
    if chosen_m is None:
        for t in m_candidates:
            for th in h_candidates:
                if streamed_fp(t, th) <= vmem_budget:
                    chosen_m, chosen_h = t, th
                    break
            if chosen_m is not None:
                break
    if chosen_m is None:                                 # last resort: smallest tiles
        chosen_m, chosen_h = m_candidates[-1], h_candidates[-1]

    assert B % chosen_m == 0, "batch must be divisible by tile_m"
    if not resident:
        assert Hp % chosen_h == 0, "hidden dim must be divisible by tile_h"

    # v7x has 2 TensorCores: ensure >= 2 steps on the 'parallel' batch axis when
    # B permits so both cores get work.
    if small_vmem and B // chosen_m < 2:
        half = chosen_m // 2
        if half >= 8 and half % 8 == 0 and B % half == 0:
            chosen_m = half

    nb = B // chosen_m

    if resident:
        grid_spec = pltpu.PrefetchScalarGridSpec(
            num_scalar_prefetch=0,
            grid=(nb,),
            in_specs=[
                pl.BlockSpec((chosen_m, Dp), lambda i: (i, 0)),   # x tile
                pl.BlockSpec((Dp, Hp), lambda i: (0, 0)),         # W1 (resident)
                pl.BlockSpec((1, Hp), lambda i: (0, 0)),          # b1
                pl.BlockSpec((Hp, Dp), lambda i: (0, 0)),         # W2 (resident)
                pl.BlockSpec((1, Dp), lambda i: (0, 0)),          # b2
            ],
            out_specs=pl.BlockSpec((chosen_m, Dp), lambda i: (i, 0)),
        )
        kernel = _resident_kernel
        semantics = ("parallel",)
        weight_passes = 1
    else:
        grid_spec = pltpu.PrefetchScalarGridSpec(
            num_scalar_prefetch=0,
            grid=(nb, Hp // chosen_h),
            in_specs=[
                pl.BlockSpec((chosen_m, Dp), lambda i, j: (i, 0)),   # x tile
                pl.BlockSpec((Dp, chosen_h), lambda i, j: (0, j)),   # W1 chunk
                pl.BlockSpec((1, chosen_h), lambda i, j: (0, j)),    # b1 chunk
                pl.BlockSpec((chosen_h, Dp), lambda i, j: (j, 0)),   # W2 chunk
                pl.BlockSpec((1, Dp), lambda i, j: (0, 0)),          # b2
            ],
            out_specs=pl.BlockSpec((chosen_m, Dp), lambda i, j: (i, 0)),
            scratch_shapes=[pltpu.VMEM((chosen_m, Dp), jnp.bfloat16)],  # bf16 x
        )
        kernel = _streamed_kernel
        semantics = ("parallel", "arbitrary")
        weight_passes = nb   # weights are re-streamed once per batch tile

    cost = pl.CostEstimate(
        flops=4 * B * Dp * Hp,                             # two matmuls
        transcendentals=0,
        bytes_accessed=(B * Dp * 4                                     # x
                        + weight_passes * (Dp * Hp * 2 + Hp * Dp * 2)  # bf16 weights
                        + (Hp + Dp) * 4                                # biases
                        + B * Dp * 4),                                 # output
    )

    out = pl.pallas_call(
        kernel,
        out_shape=jax.ShapeDtypeStruct((B, Dp), x.dtype),
        grid_spec=grid_spec,
        compiler_params=pltpu.CompilerParams(
            dimension_semantics=semantics,
            vmem_limit_bytes=vmem_budget,
        ),
        cost_estimate=cost,
    )(x_p, w1_p, b1_p, w2_p, b2_p)

    return out if Dp == D else out[:, :D]


def reference_forward(x, w1, b1, w2, b2):
    h = jnp.maximum(x @ w1 + b1, 0.0)
    y = jnp.maximum(h @ w2 + b2, 0.0)
    return y + x


def _make_params(key, D, H):
    k1, k2, k3, k4 = jax.random.split(key, 4)
    bound1 = 1.0 / jnp.sqrt(D)
    w1 = jax.random.uniform(k1, (D, H), jnp.float32, -bound1, bound1)   # fc1 weight^T
    b1 = jax.random.uniform(k2, (H,), jnp.float32, -bound1, bound1)
    bound2 = 1.0 / jnp.sqrt(H)
    w2 = jax.random.uniform(k3, (H, D), jnp.float32, -bound2, bound2)   # fc2 weight^T
    b2 = jax.random.uniform(k4, (D,), jnp.float32, -bound2, bound2)
    return w1, b1, w2, b2


if __name__ == "__main__":
    key = jax.random.PRNGKey(0)
    kx, kp, kx2, kp2 = jax.random.split(key, 4)

    # --- main check: module-sized shapes (weights-resident fast path) ------
    B, D = 8, 32
    H = D * 4
    x = jax.random.normal(kx, (B, D), dtype=jnp.float32)
    w1, b1, w2, b2 = _make_params(kp, D, H)

    out = residual_block_widen(x, w1, b1, w2, b2)
    out = jax.block_until_ready(out)
    ref = reference_forward(x, w1, b1, w2, b2)
    assert out.shape == (B, D)
    # bf16 MXU inputs (f32 accumulation) -> loosened tolerance vs f32 reference.
    assert jnp.allclose(out, ref, atol=3e-2, rtol=3e-2), "mismatch vs reference (resident)"

    # --- secondary check: exercise the hidden-dim streamed path ------------
    B2, D2 = 16, 128
    H2 = D2 * 4
    x2 = jax.random.normal(kx2, (B2, D2), dtype=jnp.float32)
    w1b, b1b, w2b, b2b = _make_params(kp2, D2, H2)
    out2 = residual_block_widen(x2, w1b, b1b, w2b, b2b,
                                force_streamed=True, tile_h=128)
    out2 = jax.block_until_ready(out2)
    ref2 = reference_forward(x2, w1b, b1b, w2b, b2b)
    assert out2.shape == (B2, D2)
    assert jnp.allclose(out2, ref2, atol=3e-2, rtol=3e-2), "mismatch vs reference (streamed)"

    print("KERNEL_OK")
</pallas_src>

<mosaic_0001>
module attributes {stable_mosaic.version = 11 : i64} {
  func.func @_resident_kernel(%arg0: i32, %arg1: memref<8x128xf32, #tpu.memory_space<vmem>>, %arg2: memref<128x128xbf16, #tpu.memory_space<vmem>>, %arg3: memref<1x128xf32, #tpu.memory_space<vmem>>, %arg4: memref<128x128xbf16, #tpu.memory_space<vmem>>, %arg5: memref<1x128xf32, #tpu.memory_space<vmem>>, %arg6: memref<8x128xf32, #tpu.memory_space<vmem>>) attributes {dimension_semantics = [#tpu.dimension_semantics<parallel>], iteration_bounds = array<i64: 1>, scalar_prefetch = 0 : i64, scratch_operands = 0 : i64, tpu.core_type = #tpu.core_type<tc>, window_params = [{transform_indices = @transform_0, window_bounds = array<i64: 8, 128>}, {pipeline_mode = #tpu.pipeline_mode<synchronous>, transform_indices = @transform_1, window_bounds = array<i64: 128, 128>}, {pipeline_mode = #tpu.pipeline_mode<synchronous>, transform_indices = @transform_2, window_bounds = array<i64: 1, 128>}, {pipeline_mode = #tpu.pipeline_mode<synchronous>, transform_indices = @transform_3, window_bounds = array<i64: 128, 128>}, {pipeline_mode = #tpu.pipeline_mode<synchronous>, transform_indices = @transform_4, window_bounds = array<i64: 1, 128>}, {transform_indices = @transform_5, window_bounds = array<i64: 8, 128>}]} {
    %c0 = arith.constant 0 : index
    %c0_0 = arith.constant 0 : index
    %0 = vector.load %arg1[%c0, %c0_0] : memref<8x128xf32, #tpu.memory_space<vmem>>, vector<8x128xf32>
    %1 = arith.truncf %0 : vector<8x128xf32> to vector<8x128xbf16>
    %c0_1 = arith.constant 0 : index
    %c0_2 = arith.constant 0 : index
    %2 = vector.load %arg2[%c0_1, %c0_2] : memref<128x128xbf16, #tpu.memory_space<vmem>>, vector<128x128xbf16>
    %cst = arith.constant dense<0.000000e+00> : vector<8x128xf32>
    %3 = tpu.matmul %1, %2, %cst {dimension_numbers = #tpu.dot_dimension_numbers<[1], [0], [0], [1], [0, 0, 1, 1], [], []>} : vector<8x128xbf16>, vector<128x128xbf16>, vector<8x128xf32> -> vector<8x128xf32>
    %c0_3 = arith.constant 0 : index
    %c0_4 = arith.constant 0 : index
    %4 = vector.load %arg3[%c0_3, %c0_4] : memref<1x128xf32, #tpu.memory_space<vmem>>, vector<1x128xf32>
    %5 = vector.broadcast %4 : vector<1x128xf32> to vector<8x128xf32>
    %6 = arith.addf %3, %5 : vector<8x128xf32>
    %cst_5 = arith.constant 0.000000e+00 : f32
    %7 = vector.broadcast %cst_5 : f32 to vector<8x128xf32>
    %8 = arith.maximumf %6, %7 : vector<8x128xf32>
    %9 = arith.truncf %8 : vector<8x128xf32> to vector<8x128xbf16>
    %c0_6 = arith.constant 0 : index
    %c0_7 = arith.constant 0 : index
    %10 = vector.load %arg4[%c0_6, %c0_7] : memref<128x128xbf16, #tpu.memory_space<vmem>>, vector<128x128xbf16>
    %cst_8 = arith.constant dense<0.000000e+00> : vector<8x128xf32>
    %11 = tpu.matmul %9, %10, %cst_8 {dimension_numbers = #tpu.dot_dimension_numbers<[1], [0], [0], [1], [0, 0, 1, 1], [], []>} : vector<8x128xbf16>, vector<128x128xbf16>, vector<8x128xf32> -> vector<8x128xf32>
    %c0_9 = arith.constant 0 : index
    %c0_10 = arith.constant 0 : index
    %12 = vector.load %arg5[%c0_9, %c0_10] : memref<1x128xf32, #tpu.memory_space<vmem>>, vector<1x128xf32>
    %13 = vector.broadcast %12 : vector<1x128xf32> to vector<8x128xf32>
    %14 = arith.addf %11, %13 : vector<8x128xf32>
    %cst_11 = arith.constant 0.000000e+00 : f32
    %15 = vector.broadcast %cst_11 : f32 to vector<8x128xf32>
    %16 = arith.maximumf %14, %15 : vector<8x128xf32>
    %17 = arith.addf %16, %0 : vector<8x128xf32>
    %c0_12 = arith.constant 0 : index
    %c0_13 = arith.constant 0 : index
    %18 = vector.load %arg6[%c0_12, %c0_13] : memref<8x128xf32, #tpu.memory_space<vmem>>, vector<8x128xf32>
    tpu.vector_store %arg6[%c0_12, %c0_13], %17 {strides = array<i32>} : memref<8x128xf32, #tpu.memory_space<vmem>>, vector<8x128xf32>,
    return
  }
  func.func @transform_0(%arg0: i32) -> (i32, i32) {
    %c0_i32 = arith.constant 0 : i32
    %c0_i32_0 = arith.constant 0 : i32
    return %arg0, %c0_i32 : i32, i32
  }
  func.func @transform_1(%arg0: i32) -> (i32, i32) {
    %c0_i32 = arith.constant 0 : i32
    %c0_i32_0 = arith.constant 0 : i32
    %c0_i32_1 = arith.constant 0 : i32
    return %c0_i32, %c0_i32_0 : i32, i32
  }
  func.func @transform_2(%arg0: i32) -> (i32, i32) {
    %c0_i32 = arith.constant 0 : i32
    %c0_i32_0 = arith.constant 0 : i32
    %c0_i32_1 = arith.constant 0 : i32
    return %c0_i32, %c0_i32_0 : i32, i32
  }
  func.func @transform_3(%arg0: i32) -> (i32, i32) {
    %c0_i32 = arith.constant 0 : i32
    %c0_i32_0 = arith.constant 0 : i32
    %c0_i32_1 = arith.constant 0 : i32
    return %c0_i32, %c0_i32_0 : i32, i32
  }
  func.func @transform_4(%arg0: i32) -> (i32, i32) {
    %c0_i32 = arith.constant 0 : i32
    %c0_i32_0 = arith.constant 0 : i32
    %c0_i32_1 = arith.constant 0 : i32
    return %c0_i32, %c0_i32_0 : i32, i32
  }
  func.func @transform_5(%arg0: i32) -> (i32, i32) {
    %c0_i32 = arith.constant 0 : i32
    %c0_i32_0 = arith.constant 0 : i32
    return %arg0, %c0_i32 : i32, i32
  }
}

</mosaic_0001>

<bundles_post_ra>
// kernel: tpu_custom_call.1
= control target key start
LH: loop header
LB: loop body
LE: loop exit
PB: predicated region body
PF: predicated region fallthrough
CT: control target
= control target key end

     0   :  { %10 = vsyncpa [#allocation3], 0  ;;  %s497_s0 = inlined_call_operand.hbm [shape: f32[8,128], index: 0, kind: input, shape index: {}]   ;;  %s498_s1 = inlined_call_operand.hbm [shape: bf16[128,128], index: 1, kind: input, shape index: {}]   ;;  %s499_s2 = inlined_call_operand.vmem [shape: f32[1,128], index: 2, kind: input, shape index: {}]   ;;  %s500_s3 = inlined_call_operand.hbm [shape: bf16[128,128], index: 3, kind: input, shape index: {}]   ;;  %s501_s4 = inlined_call_operand.vmem [shape: f32[1,128], index: 4, kind: input, shape index: {}]   ;;  %s502_s5 = inlined_call_operand.hbm [shape: f32[8,128], index: 5, kind: output, shape index: {}]  }
   0x1   :  { %11 = vsyncpa [#allocation6], 0  ;;  %s28_s20 = sshll.u32 %s498_s1, 4  ;;  %s29_s20 = int_to_ptr.hbm [resolvable:$true] %s28_s20 }
   0x2   :  { %12 = vsyncpa [#allocation4], 0  ;;  %s443_s21 = smov [#allocation5]   ;;  %s18_s25 = sshll.u32 %s497_s0, 4  ;;  %s19_s25 = int_to_ptr.hbm [resolvable:$true] %s18_s25 }
   0x3   :  { %s30_s22 = sshll.u32 %s443_s21, 4  ;;  %s444_s26 = smov 64   ;;  %s31_s22 = int_to_ptr.vmem [resolvable:$true] %s30_s22 }
   0x4   :  { %s445_s27 = smov 4   ;;  %s446_s28 = smov [#allocation2]  }
   0x5   :  { %36 = dma.hbm_to_vmem [thread:$0]  %s29_s20, 1024, %s31_s22, [#allocation6], %s444_s26, %s444_s26, %s445_s27  }
   0x6   :  { %s20_s29 = sshll.u32 %s446_s28, 4  ;;  %s43_s7 = sshll.u32 %s500_s3, 4  ;;  %s21_s29 = int_to_ptr.vmem [resolvable:$true] %s20_s29  ;;  %s44_s7 = int_to_ptr.hbm [resolvable:$true] %s43_s7 }
   0x7   :  { %23 = dma.hbm_to_vmem [thread:$0]  %s19_s25, 128, %s21_s29, [#allocation3]  }
   0x8   :  { %s447_s1 = smov [#allocation7]  }
   0x9   :  { %s45_s8 = sshll.u32 %s447_s1, 4  ;;  %s46_s8 = int_to_ptr.vmem [resolvable:$true] %s45_s8 }
   0xa   :  { %51 = dma.hbm_to_vmem [thread:$0]  %s44_s7, 1024, %s46_s8, [#allocation6], %s444_s26, %s444_s26, %s445_s27  }
   0xb   :  { %437 = dma.done.wait [#allocation3], 128  }
   0xc   :  { %438 = vsyncadd [#allocation3], 4294967168 }
   0xd   :  { %439 = dma.done.wait [#allocation6], 2048  }
   0xe   :  { %440 = vsyncadd [#allocation6], 4294965248  ;;  %v324_v0 = vld [vmem:[#allocation5 + $0x38] sm:$0xff]  ;;  %v323_v1 = vld [vmem:[#allocation5 + $0x30] sm:$0xff]  ;;  %s448_s11 = smov [#allocation8]   ;;  %s242_s15 = sshll.u32 %s502_s5, 4  ;;  %s243_s15 = int_to_ptr.hbm [resolvable:$true] %s242_s15 }
   0xf   :  { %136 = vmatpush.bf16.msra.mxu0 %v324_v0  ;;  %v332_v2 = vld [vmem:[#allocation7 + $0x38] sm:$0xff]  ;;  %v331_v3 = vld [vmem:[#allocation7 + $0x30] sm:$0xff]  ;;  %v322_v4 = vld [vmem:[#allocation5 + $0x28] sm:$0xff]  ;;  %s240_s12 = sshll.u32 %s448_s11, 4  ;;  %s241_s12 = int_to_ptr.vmem [resolvable:$true] %s240_s12 }
  0x10   :  { %219 = vmatpush.bf16.msra.mxu1 %v332_v2  ;;  %v330_v5 = vld [vmem:[#allocation7 + $0x28] sm:$0xff]  ;;  %v321_v6 = vld [vmem:[#allocation5 + $0x20] sm:$0xff]  ;;  %v320_v8 = vld [vmem:[#allocation5 + $0x18] sm:$0xff] }
  0x11   :  { %v329_v7 = vld [vmem:[#allocation7 + $0x20] sm:$0xff]  ;;  %v328_v9 = vld [vmem:[#allocation7 + $0x18] sm:$0xff]  ;;  %v319_v10 = vld [vmem:[#allocation5 + $0x10] sm:$0xff] }
  0x12   :  { %v327_v11 = vld [vmem:[#allocation7 + $0x10] sm:$0xff]  ;;  %v318_v12 = vld [vmem:[#allocation5 + $0x8] sm:$0xff]  ;;  %v317_v13 = vld [vmem:[#allocation5] sm:$0xff] }
  0x13   :  { %137 = vmatpush.bf16.msra.mxu0 %v323_v1  ;;  %v66_v14 = vld [vmem:[#allocation2] sm:$0xff]  ;;  %v326_v16 = vld [vmem:[#allocation7 + $0x8] sm:$0xff]  ;;  %v325_v17 = vld [vmem:[#allocation7] sm:$0xff] }
  0x14   :  { %220 = vmatpush.bf16.msra.mxu1 %v331_v3  ;;  %v67_v15 = vpack.c.bf16 %v66_v14, %v66_v14  ;;  %v339_v18 = vld [vmem:[%s499_s2] ss:$0 sm:$0xff] }
  0x15   :  { %v340_v24 = vld [vmem:[%s501_s4] ss:$0 sm:$0xff] }
  0x17   :  { %138 = vmatpush.bf16.msra.mxu0 %v322_v4 }
  0x18   :  { %221 = vmatpush.bf16.msra.mxu1 %v330_v5 }
  0x1b   :  { %139 = vmatpush.bf16.msra.mxu0 %v321_v6 }
  0x1c   :  { %222 = vmatpush.bf16.msra.mxu1 %v329_v7 }
  0x1f   :  { %140 = vmatpush.bf16.msra.mxu0 %v320_v8 }
  0x20   :  { %223 = vmatpush.bf16.msra.mxu1 %v328_v9 }
  0x23   :  { %141 = vmatpush.bf16.msra.mxu0 %v319_v10 }
  0x24   :  { %224 = vmatpush.bf16.msra.mxu1 %v327_v11 }
  0x27   :  { %142 = vmatpush.bf16.msra.mxu0 %v318_v12 }
  0x28   :  { %225 = vmatpush.bf16.msra.mxu1 %v326_v16 }
  0x2b   :  { %143 = vmatpush.bf16.msra.mxu0 %v317_v13 }
  0x2c   :  { %226 = vmatpush.bf16.msra.mxu1 %v325_v17 }
  0x2e   :  { %144 = vmatmul.bf16.vlgmr.msra.gmra.mxu0 %v67_v15 }
  0xab   :  { %v145_v19 = vpop.f32.mrf.mxu0 }
  0xac   :  { %v146_v20 = vadd.f32 %v339_v18, %v145_v19 }
  0xae   :  { %v149_v21 = vmax.f32 %v146_v20, 0.0 }
  0xb0   :  { %v150_v22 = vpack.c.bf16 %v149_v21, %v149_v21 }
  0xb2   :  { %227 = vmatmul.bf16.vlgmr.msra.gmra.mxu1 %v150_v22 }
  0xb3   :  { %v147_v23 = vpop.f32.mrf.mxu0 }
 0x12f   :  { %v228_v25 = vpop.f32.mrf.mxu1 }
 0x130   :  { %v229_v26 = vadd.f32 %v340_v24, %v228_v25 }
 0x132   :  { %v232_v27 = vmax.f32 %v229_v26, 0.0 }
 0x134   :  { %v233_v28 = vadd.f32 %v232_v27, %v66_v14 }
 0x136   :  { %234 = vst [vmem:[#allocation8] sm:$0xff] %v233_v28 }
 0x137   :  { %v230_v29 = vpop.f32.mrf.mxu1  ;;  %245 = dma.vmem_to_hbm [thread:$0]  %s241_s12, 128, %s243_s15, [#allocation4]  }
 0x138   :  { %441 = dma.done.wait [#allocation4], 128  }
 0x139   :  { %442 = vsyncadd [#allocation4], 4294967168 }
 0x13a   :  { %250 = vsyncpa [#allocation3], 1 }
 0x13b   :  { %251 = vsyncpa [#allocation6], 1 }
 0x13c   :  { %252 = vsyncpa [#allocation4], 1 }

</bundles_post_ra>
